<compile_context>
chip_gen: v5e
topology: v5e:2x2
jax: 0.10.0
libtpu: 0.0.40
codegen_flags: <defaults>
</compile_context>

<pallas_src>
import functools

import jax
import jax.numpy as jnp
from jax import lax
from jax.experimental import pallas as pl
from jax.experimental.pallas import tpu as pltpu

EPS = 1e-12  # torch.nn.functional.normalize default eps


def _l2_normalize(v):
    # v / max(||v||_2, eps)  ==  v * rsqrt(max(||v||^2, eps^2))
    sq = jnp.sum(v * v, axis=-1, keepdims=True)
    return v * lax.rsqrt(jnp.maximum(sq, EPS * EPS))


def _routing_kernel(x_ref, z_ref, o_ref, *, routing_iter, m):
    # x_ref: (tn, d)      pre-normalized node rows
    # z_ref: (m, tn, d)   pre-normalized neighbor rows, neighbor-major
    # o_ref: (tn, d)
    x_n = x_ref[...].astype(jnp.float32)

    def z(j):
        return z_ref[j].astype(jnp.float32)   # (tn, d) lane-dense slab

    # ---- iteration 0: softmax over zeros is uniform 1/m --------------------
    acc = z(0)
    for j in range(1, m):
        acc = acc + z(j)
    u = acc * (1.0 / m) + x_n
    if routing_iter > 1:
        u = _l2_normalize(u)

    # ---- iterations 1 .. routing_iter-1 -------------------------------------
    for it in range(1, routing_iter):
        # logits p_j = <z_j, u> per row -> m vectors of shape (tn, 1)
        p = [jnp.sum(z(j) * u, axis=-1, keepdims=True) for j in range(m)]
        p_max = p[0]
        for j in range(1, m):
            p_max = jnp.maximum(p_max, p[j])
        e = [jnp.exp(pj - p_max) for pj in p]
        s = e[0]
        for j in range(1, m):
            s = s + e[j]
        inv_s = pl.reciprocal(s, approx=True)   # EUP slot, frees VALU
        # u = sum_j softmax_j * z_j + x_n
        u_new = x_n + (e[0] * inv_s) * z(0)
        for j in range(1, m):
            u_new = u_new + (e[j] * inv_s) * z(j)
        u = u_new
        if it < routing_iter - 1:
            u = _l2_normalize(u)

    o_ref[...] = u.astype(o_ref.dtype)


def neighbor_routing_agg(x, x_nb, routing_iter, tn=512):
    """x: (n, d) float, x_nb: (n, m) int32 1-indexed neighbor ids."""
    n, d = x.shape
    m = x_nb.shape[1]
    assert routing_iter >= 1

    # Normalize each node once; gather pre-normalized rows directly in
    # neighbor-major (m, n, d) layout so the kernel sees lane-dense (tn, d)
    # slabs per neighbor slot (no wrapper-side transpose of the big tensor).
    x_n = _l2_normalize(x.astype(jnp.float32))
    # TODO(synk): the data-dependent row gather stays as plain-JAX glue; an
    # in-kernel gather would need per-row manual DMA (no BlockSpec form).
    # NOTE: jnp.take clips OOB indices, so padding ids (e.g. 0) alias row 0.
    z_t = jnp.take(x_n, x_nb.T - 1, axis=0)        # (m, n, d)

    # Large n-tile (multiple of 8); pad ragged n with zero rows (safe: zeros
    # stay zeros through the routing math) and slice the result back.
    tn = int(max(8, min(tn, pl.cdiv(n, 8) * 8)))
    n_pad = int(pl.cdiv(n, tn)) * tn
    if n_pad != n:
        x_n = jnp.pad(x_n, ((0, n_pad - n), (0, 0)))
        z_t = jnp.pad(z_t, ((0, 0), (0, n_pad - n), (0, 0)))

    tile_bytes = tn * d * 4 * (m + 2)   # z slab + x + out tiles (per buffer)
    vmem_limit = int(min(64 * 1024 * 1024,
                         max(32 * 1024 * 1024, 4 * tile_bytes)))

    kernel = functools.partial(_routing_kernel, routing_iter=routing_iter, m=m)
    out = pl.pallas_call(
        kernel,
        out_shape=jax.ShapeDtypeStruct((n_pad, d), x.dtype),
        grid_spec=pltpu.PrefetchScalarGridSpec(
            num_scalar_prefetch=0,
            grid=(n_pad // tn,),
            in_specs=[
                pl.BlockSpec((tn, d), lambda i: (i, 0)),
                pl.BlockSpec((m, tn, d), lambda i: (0, i, 0)),
            ],
            out_specs=pl.BlockSpec((tn, d), lambda i: (i, 0)),
        ),
        compiler_params=pltpu.CompilerParams(
            dimension_semantics=("parallel",),
            vmem_limit_bytes=vmem_limit,
        ),
    )(x_n, z_t)
    return out[:n]


def _reference(x, x_nb, routing_iter):
    # pure-JAX mirror of the PyTorch forward
    n, d = x.shape
    m = x_nb.shape[1]
    xf = x.astype(jnp.float32)
    nrm = jnp.sqrt(jnp.sum(xf * xf, axis=-1, keepdims=True))
    xn = xf / jnp.maximum(nrm, EPS)
    z = xn[x_nb - 1].reshape(n, m, d)
    u = None
    for it in range(routing_iter):
        if u is None:
            p = jnp.zeros((n, m), jnp.float32)
        else:
            p = jnp.sum(z * u.reshape(n, 1, d), axis=2)
        p = jax.nn.softmax(p, axis=1)
        u = jnp.sum(z * p.reshape(n, m, 1), axis=1) + xn
        if it < routing_iter - 1:
            un = jnp.sqrt(jnp.sum(u * u, axis=-1, keepdims=True))
            u = u / jnp.maximum(un, EPS)
    return u


if __name__ == "__main__":
    n, m, d = 16, 8, 32
    routing_iter = 3

    key = jax.random.PRNGKey(0)
    kx, knb = jax.random.split(key)
    x = jax.random.normal(kx, (n, d), dtype=jnp.float32)
    # 1-indexed neighbor ids (x_nb - 1 indexes x), as in the PyTorch module.
    x_nb = jax.random.randint(knb, (n, m), minval=1, maxval=n + 1,
                              dtype=jnp.int32)

    out = neighbor_routing_agg(x, x_nb, routing_iter)
    out = jax.block_until_ready(out)

    ref = _reference(x, x_nb, routing_iter)
    assert out.shape == (n, d)
    # tolerance leaves headroom for the EUP approx-reciprocal in the softmax
    assert jnp.allclose(out, ref, atol=5e-3, rtol=5e-3), float(
        jnp.max(jnp.abs(out - ref)))

    print("KERNEL_OK")
</pallas_src>

<mosaic_0001>
module attributes {stable_mosaic.version = 11 : i64} {
  func.func @_routing_kernel(%arg0: i32, %arg1: memref<16x32xf32, #tpu.memory_space<vmem>>, %arg2: memref<8x16x32xf32, #tpu.memory_space<vmem>>, %arg3: memref<16x32xf32, #tpu.memory_space<vmem>>) attributes {dimension_semantics = [#tpu.dimension_semantics<parallel>], iteration_bounds = array<i64: 1>, scalar_prefetch = 0 : i64, scratch_operands = 0 : i64, tpu.core_type = #tpu.core_type<tc>, window_params = [{transform_indices = @transform_0, window_bounds = array<i64: 16, 32>}, {transform_indices = @transform_1, window_bounds = array<i64: 8, 16, 32>}, {transform_indices = @transform_2, window_bounds = array<i64: 16, 32>}]} {
    %c0 = arith.constant 0 : index
    %c0_0 = arith.constant 0 : index
    %0 = vector.load %arg1[%c0, %c0_0] : memref<16x32xf32, #tpu.memory_space<vmem>>, vector<16x32xf32>
    %c0_1 = arith.constant 0 : index
    %c0_2 = arith.constant 0 : index
    %c0_3 = arith.constant 0 : index
    %1 = vector.load %arg2[%c0_1, %c0_2, %c0_3] : memref<8x16x32xf32, #tpu.memory_space<vmem>>, vector<1x16x32xf32>
    %2 = vector.shape_cast %1 : vector<1x16x32xf32> to vector<16x32xf32>
    %c1 = arith.constant 1 : index
    %c0_4 = arith.constant 0 : index
    %c0_5 = arith.constant 0 : index
    %3 = vector.load %arg2[%c1, %c0_4, %c0_5] : memref<8x16x32xf32, #tpu.memory_space<vmem>>, vector<1x16x32xf32>
    %4 = vector.shape_cast %3 : vector<1x16x32xf32> to vector<16x32xf32>
    %5 = arith.addf %2, %4 : vector<16x32xf32>
    %c2 = arith.constant 2 : index
    %c0_6 = arith.constant 0 : index
    %c0_7 = arith.constant 0 : index
    %6 = vector.load %arg2[%c2, %c0_6, %c0_7] : memref<8x16x32xf32, #tpu.memory_space<vmem>>, vector<1x16x32xf32>
    %7 = vector.shape_cast %6 : vector<1x16x32xf32> to vector<16x32xf32>
    %8 = arith.addf %5, %7 : vector<16x32xf32>
    %c3 = arith.constant 3 : index
    %c0_8 = arith.constant 0 : index
    %c0_9 = arith.constant 0 : index
    %9 = vector.load %arg2[%c3, %c0_8, %c0_9] : memref<8x16x32xf32, #tpu.memory_space<vmem>>, vector<1x16x32xf32>
    %10 = vector.shape_cast %9 : vector<1x16x32xf32> to vector<16x32xf32>
    %11 = arith.addf %8, %10 : vector<16x32xf32>
    %c4 = arith.constant 4 : index
    %c0_10 = arith.constant 0 : index
    %c0_11 = arith.constant 0 : index
    %12 = vector.load %arg2[%c4, %c0_10, %c0_11] : memref<8x16x32xf32, #tpu.memory_space<vmem>>, vector<1x16x32xf32>
    %13 = vector.shape_cast %12 : vector<1x16x32xf32> to vector<16x32xf32>
    %14 = arith.addf %11, %13 : vector<16x32xf32>
    %c5 = arith.constant 5 : index
    %c0_12 = arith.constant 0 : index
    %c0_13 = arith.constant 0 : index
    %15 = vector.load %arg2[%c5, %c0_12, %c0_13] : memref<8x16x32xf32, #tpu.memory_space<vmem>>, vector<1x16x32xf32>
    %16 = vector.shape_cast %15 : vector<1x16x32xf32> to vector<16x32xf32>
    %17 = arith.addf %14, %16 : vector<16x32xf32>
    %c6 = arith.constant 6 : index
    %c0_14 = arith.constant 0 : index
    %c0_15 = arith.constant 0 : index
    %18 = vector.load %arg2[%c6, %c0_14, %c0_15] : memref<8x16x32xf32, #tpu.memory_space<vmem>>, vector<1x16x32xf32>
    %19 = vector.shape_cast %18 : vector<1x16x32xf32> to vector<16x32xf32>
    %20 = arith.addf %17, %19 : vector<16x32xf32>
    %c7 = arith.constant 7 : index
    %c0_16 = arith.constant 0 : index
    %c0_17 = arith.constant 0 : index
    %21 = vector.load %arg2[%c7, %c0_16, %c0_17] : memref<8x16x32xf32, #tpu.memory_space<vmem>>, vector<1x16x32xf32>
    %22 = vector.shape_cast %21 : vector<1x16x32xf32> to vector<16x32xf32>
    %23 = arith.addf %20, %22 : vector<16x32xf32>
    %cst = arith.constant 1.250000e-01 : f32
    %24 = vector.broadcast %cst : f32 to vector<16x32xf32>
    %25 = arith.mulf %23, %24 : vector<16x32xf32>
    %26 = arith.addf %25, %0 : vector<16x32xf32>
    %27 = arith.mulf %26, %26 : vector<16x32xf32>
    %cst_18 = arith.constant dense<0.000000e+00> : vector<16xf32>
    %28 = vector.multi_reduction <add>, %27, %cst_18 [1] : vector<16x32xf32> to vector<16xf32>
    %29 = vector.shape_cast %28 : vector<16xf32> to vector<16x1xf32>
    %cst_19 = arith.constant 1.000000e-24 : f32
    %30 = vector.broadcast %cst_19 : f32 to vector<16x1xf32>
    %31 = arith.maximumf %29, %30 : vector<16x1xf32>
    %32 = math.rsqrt %31 : vector<16x1xf32>
    %33 = vector.broadcast %32 : vector<16x1xf32> to vector<16x32xf32>
    %34 = arith.mulf %26, %33 : vector<16x32xf32>
    %c0_20 = arith.constant 0 : index
    %c0_21 = arith.constant 0 : index
    %c0_22 = arith.constant 0 : index
    %35 = vector.load %arg2[%c0_20, %c0_21, %c0_22] : memref<8x16x32xf32, #tpu.memory_space<vmem>>, vector<1x16x32xf32>
    %36 = vector.shape_cast %35 : vector<1x16x32xf32> to vector<16x32xf32>
    %37 = arith.mulf %36, %34 : vector<16x32xf32>
    %cst_23 = arith.constant dense<0.000000e+00> : vector<16xf32>
    %38 = vector.multi_reduction <add>, %37, %cst_23 [1] : vector<16x32xf32> to vector<16xf32>
    %39 = vector.shape_cast %38 : vector<16xf32> to vector<16x1xf32>
    %c1_24 = arith.constant 1 : index
    %c0_25 = arith.constant 0 : index
    %c0_26 = arith.constant 0 : index
    %40 = vector.load %arg2[%c1_24, %c0_25, %c0_26] : memref<8x16x32xf32, #tpu.memory_space<vmem>>, vector<1x16x32xf32>
    %41 = vector.shape_cast %40 : vector<1x16x32xf32> to vector<16x32xf32>
    %42 = arith.mulf %41, %34 : vector<16x32xf32>
    %cst_27 = arith.constant dense<0.000000e+00> : vector<16xf32>
    %43 = vector.multi_reduction <add>, %42, %cst_27 [1] : vector<16x32xf32> to vector<16xf32>
    %44 = vector.shape_cast %43 : vector<16xf32> to vector<16x1xf32>
    %c2_28 = arith.constant 2 : index
    %c0_29 = arith.constant 0 : index
    %c0_30 = arith.constant 0 : index
    %45 = vector.load %arg2[%c2_28, %c0_29, %c0_30] : memref<8x16x32xf32, #tpu.memory_space<vmem>>, vector<1x16x32xf32>
    %46 = vector.shape_cast %45 : vector<1x16x32xf32> to vector<16x32xf32>
    %47 = arith.mulf %46, %34 : vector<16x32xf32>
    %cst_31 = arith.constant dense<0.000000e+00> : vector<16xf32>
    %48 = vector.multi_reduction <add>, %47, %cst_31 [1] : vector<16x32xf32> to vector<16xf32>
    %49 = vector.shape_cast %48 : vector<16xf32> to vector<16x1xf32>
    %c3_32 = arith.constant 3 : index
    %c0_33 = arith.constant 0 : index
    %c0_34 = arith.constant 0 : index
    %50 = vector.load %arg2[%c3_32, %c0_33, %c0_34] : memref<8x16x32xf32, #tpu.memory_space<vmem>>, vector<1x16x32xf32>
    %51 = vector.shape_cast %50 : vector<1x16x32xf32> to vector<16x32xf32>
    %52 = arith.mulf %51, %34 : vector<16x32xf32>
    %cst_35 = arith.constant dense<0.000000e+00> : vector<16xf32>
    %53 = vector.multi_reduction <add>, %52, %cst_35 [1] : vector<16x32xf32> to vector<16xf32>
    %54 = vector.shape_cast %53 : vector<16xf32> to vector<16x1xf32>
    %c4_36 = arith.constant 4 : index
    %c0_37 = arith.constant 0 : index
    %c0_38 = arith.constant 0 : index
    %55 = vector.load %arg2[%c4_36, %c0_37, %c0_38] : memref<8x16x32xf32, #tpu.memory_space<vmem>>, vector<1x16x32xf32>
    %56 = vector.shape_cast %55 : vector<1x16x32xf32> to vector<16x32xf32>
    %57 = arith.mulf %56, %34 : vector<16x32xf32>
    %cst_39 = arith.constant dense<0.000000e+00> : vector<16xf32>
    %58 = vector.multi_reduction <add>, %57, %cst_39 [1] : vector<16x32xf32> to vector<16xf32>
    %59 = vector.shape_cast %58 : vector<16xf32> to vector<16x1xf32>
    %c5_40 = arith.constant 5 : index
    %c0_41 = arith.constant 0 : index
    %c0_42 = arith.constant 0 : index
    %60 = vector.load %arg2[%c5_40, %c0_41, %c0_42] : memref<8x16x32xf32, #tpu.memory_space<vmem>>, vector<1x16x32xf32>
    %61 = vector.shape_cast %60 : vector<1x16x32xf32> to vector<16x32xf32>
    %62 = arith.mulf %61, %34 : vector<16x32xf32>
    %cst_43 = arith.constant dense<0.000000e+00> : vector<16xf32>
    %63 = vector.multi_reduction <add>, %62, %cst_43 [1] : vector<16x32xf32> to vector<16xf32>
    %64 = vector.shape_cast %63 : vector<16xf32> to vector<16x1xf32>
    %c6_44 = arith.constant 6 : index
    %c0_45 = arith.constant 0 : index
    %c0_46 = arith.constant 0 : index
    %65 = vector.load %arg2[%c6_44, %c0_45, %c0_46] : memref<8x16x32xf32, #tpu.memory_space<vmem>>, vector<1x16x32xf32>
    %66 = vector.shape_cast %65 : vector<1x16x32xf32> to vector<16x32xf32>
    %67 = arith.mulf %66, %34 : vector<16x32xf32>
    %cst_47 = arith.constant dense<0.000000e+00> : vector<16xf32>
    %68 = vector.multi_reduction <add>, %67, %cst_47 [1] : vector<16x32xf32> to vector<16xf32>
    %69 = vector.shape_cast %68 : vector<16xf32> to vector<16x1xf32>
    %c7_48 = arith.constant 7 : index
    %c0_49 = arith.constant 0 : index
    %c0_50 = arith.constant 0 : index
    %70 = vector.load %arg2[%c7_48, %c0_49, %c0_50] : memref<8x16x32xf32, #tpu.memory_space<vmem>>, vector<1x16x32xf32>
    %71 = vector.shape_cast %70 : vector<1x16x32xf32> to vector<16x32xf32>
    %72 = arith.mulf %71, %34 : vector<16x32xf32>
    %cst_51 = arith.constant dense<0.000000e+00> : vector<16xf32>
    %73 = vector.multi_reduction <add>, %72, %cst_51 [1] : vector<16x32xf32> to vector<16xf32>
    %74 = vector.shape_cast %73 : vector<16xf32> to vector<16x1xf32>
    %75 = arith.maximumf %39, %44 : vector<16x1xf32>
    %76 = arith.maximumf %75, %49 : vector<16x1xf32>
    %77 = arith.maximumf %76, %54 : vector<16x1xf32>
    %78 = arith.maximumf %77, %59 : vector<16x1xf32>
    %79 = arith.maximumf %78, %64 : vector<16x1xf32>
    %80 = arith.maximumf %79, %69 : vector<16x1xf32>
    %81 = arith.maximumf %80, %74 : vector<16x1xf32>
    %82 = arith.subf %39, %81 : vector<16x1xf32>
    %83 = math.exp %82 : vector<16x1xf32>
    %84 = arith.subf %44, %81 : vector<16x1xf32>
    %85 = math.exp %84 : vector<16x1xf32>
    %86 = arith.subf %49, %81 : vector<16x1xf32>
    %87 = math.exp %86 : vector<16x1xf32>
    %88 = arith.subf %54, %81 : vector<16x1xf32>
    %89 = math.exp %88 : vector<16x1xf32>
    %90 = arith.subf %59, %81 : vector<16x1xf32>
    %91 = math.exp %90 : vector<16x1xf32>
    %92 = arith.subf %64, %81 : vector<16x1xf32>
    %93 = math.exp %92 : vector<16x1xf32>
    %94 = arith.subf %69, %81 : vector<16x1xf32>
    %95 = math.exp %94 : vector<16x1xf32>
    %96 = arith.subf %74, %81 : vector<16x1xf32>
    %97 = math.exp %96 : vector<16x1xf32>
    %98 = arith.addf %83, %85 : vector<16x1xf32>
    %99 = arith.addf %98, %87 : vector<16x1xf32>
    %100 = arith.addf %99, %89 : vector<16x1xf32>
    %101 = arith.addf %100, %91 : vector<16x1xf32>
    %102 = arith.addf %101, %93 : vector<16x1xf32>
    %103 = arith.addf %102, %95 : vector<16x1xf32>
    %104 = arith.addf %103, %97 : vector<16x1xf32>
    %105 = tpu.reciprocal %104 {approx = true} : vector<16x1xf32> -> vector<16x1xf32>
    %106 = arith.mulf %83, %105 : vector<16x1xf32>
    %c0_52 = arith.constant 0 : index
    %c0_53 = arith.constant 0 : index
    %c0_54 = arith.constant 0 : index
    %107 = vector.load %arg2[%c0_52, %c0_53, %c0_54] : memref<8x16x32xf32, #tpu.memory_space<vmem>>, vector<1x16x32xf32>
    %108 = vector.shape_cast %107 : vector<1x16x32xf32> to vector<16x32xf32>
    %109 = vector.broadcast %106 : vector<16x1xf32> to vector<16x32xf32>
    %110 = arith.mulf %109, %108 : vector<16x32xf32>
    %111 = arith.addf %0, %110 : vector<16x32xf32>
    %112 = arith.mulf %85, %105 : vector<16x1xf32>
    %c1_55 = arith.constant 1 : index
    %c0_56 = arith.constant 0 : index
    %c0_57 = arith.constant 0 : index
    %113 = vector.load %arg2[%c1_55, %c0_56, %c0_57] : memref<8x16x32xf32, #tpu.memory_space<vmem>>, vector<1x16x32xf32>
    %114 = vector.shape_cast %113 : vector<1x16x32xf32> to vector<16x32xf32>
    %115 = vector.broadcast %112 : vector<16x1xf32> to vector<16x32xf32>
    %116 = arith.mulf %115, %114 : vector<16x32xf32>
    %117 = arith.addf %111, %116 : vector<16x32xf32>
    %118 = arith.mulf %87, %105 : vector<16x1xf32>
    %c2_58 = arith.constant 2 : index
    %c0_59 = arith.constant 0 : index
    %c0_60 = arith.constant 0 : index
    %119 = vector.load %arg2[%c2_58, %c0_59, %c0_60] : memref<8x16x32xf32, #tpu.memory_space<vmem>>, vector<1x16x32xf32>
    %120 = vector.shape_cast %119 : vector<1x16x32xf32> to vector<16x32xf32>
    %121 = vector.broadcast %118 : vector<16x1xf32> to vector<16x32xf32>
    %122 = arith.mulf %121, %120 : vector<16x32xf32>
    %123 = arith.addf %117, %122 : vector<16x32xf32>
    %124 = arith.mulf %89, %105 : vector<16x1xf32>
    %c3_61 = arith.constant 3 : index
    %c0_62 = arith.constant 0 : index
    %c0_63 = arith.constant 0 : index
    %125 = vector.load %arg2[%c3_61, %c0_62, %c0_63] : memref<8x16x32xf32, #tpu.memory_space<vmem>>, vector<1x16x32xf32>
    %126 = vector.shape_cast %125 : vector<1x16x32xf32> to vector<16x32xf32>
    %127 = vector.broadcast %124 : vector<16x1xf32> to vector<16x32xf32>
    %128 = arith.mulf %127, %126 : vector<16x32xf32>
    %129 = arith.addf %123, %128 : vector<16x32xf32>
    %130 = arith.mulf %91, %105 : vector<16x1xf32>
    %c4_64 = arith.constant 4 : index
    %c0_65 = arith.constant 0 : index
    %c0_66 = arith.constant 0 : index
    %131 = vector.load %arg2[%c4_64, %c0_65, %c0_66] : memref<8x16x32xf32, #tpu.memory_space<vmem>>, vector<1x16x32xf32>
    %132 = vector.shape_cast %131 : vector<1x16x32xf32> to vector<16x32xf32>
    %133 = vector.broadcast %130 : vector<16x1xf32> to vector<16x32xf32>
    %134 = arith.mulf %133, %132 : vector<16x32xf32>
    %135 = arith.addf %129, %134 : vector<16x32xf32>
    %136 = arith.mulf %93, %105 : vector<16x1xf32>
    %c5_67 = arith.constant 5 : index
    %c0_68 = arith.constant 0 : index
    %c0_69 = arith.constant 0 : index
    %137 = vector.load %arg2[%c5_67, %c0_68, %c0_69] : memref<8x16x32xf32, #tpu.memory_space<vmem>>, vector<1x16x32xf32>
    %138 = vector.shape_cast %137 : vector<1x16x32xf32> to vector<16x32xf32>
    %139 = vector.broadcast %136 : vector<16x1xf32> to vector<16x32xf32>
    %140 = arith.mulf %139, %138 : vector<16x32xf32>
    %141 = arith.addf %135, %140 : vector<16x32xf32>
    %142 = arith.mulf %95, %105 : vector<16x1xf32>
    %c6_70 = arith.constant 6 : index
    %c0_71 = arith.constant 0 : index
    %c0_72 = arith.constant 0 : index
    %143 = vector.load %arg2[%c6_70, %c0_71, %c0_72] : memref<8x16x32xf32, #tpu.memory_space<vmem>>, vector<1x16x32xf32>
    %144 = vector.shape_cast %143 : vector<1x16x32xf32> to vector<16x32xf32>
    %145 = vector.broadcast %142 : vector<16x1xf32> to vector<16x32xf32>
    %146 = arith.mulf %145, %144 : vector<16x32xf32>
    %147 = arith.addf %141, %146 : vector<16x32xf32>
    %148 = arith.mulf %97, %105 : vector<16x1xf32>
    %c7_73 = arith.constant 7 : index
    %c0_74 = arith.constant 0 : index
    %c0_75 = arith.constant 0 : index
    %149 = vector.load %arg2[%c7_73, %c0_74, %c0_75] : memref<8x16x32xf32, #tpu.memory_space<vmem>>, vector<1x16x32xf32>
    %150 = vector.shape_cast %149 : vector<1x16x32xf32> to vector<16x32xf32>
    %151 = vector.broadcast %148 : vector<16x1xf32> to vector<16x32xf32>
    %152 = arith.mulf %151, %150 : vector<16x32xf32>
    %153 = arith.addf %147, %152 : vector<16x32xf32>
    %154 = arith.mulf %153, %153 : vector<16x32xf32>
    %cst_76 = arith.constant dense<0.000000e+00> : vector<16xf32>
    %155 = vector.multi_reduction <add>, %154, %cst_76 [1] : vector<16x32xf32> to vector<16xf32>
    %156 = vector.shape_cast %155 : vector<16xf32> to vector<16x1xf32>
    %cst_77 = arith.constant 1.000000e-24 : f32
    %157 = vector.broadcast %cst_77 : f32 to vector<16x1xf32>
    %158 = arith.maximumf %156, %157 : vector<16x1xf32>
    %159 = math.rsqrt %158 : vector<16x1xf32>
    %160 = vector.broadcast %159 : vector<16x1xf32> to vector<16x32xf32>
    %161 = arith.mulf %153, %160 : vector<16x32xf32>
    %c0_78 = arith.constant 0 : index
    %c0_79 = arith.constant 0 : index
    %c0_80 = arith.constant 0 : index
    %162 = vector.load %arg2[%c0_78, %c0_79, %c0_80] : memref<8x16x32xf32, #tpu.memory_space<vmem>>, vector<1x16x32xf32>
    %163 = vector.shape_cast %162 : vector<1x16x32xf32> to vector<16x32xf32>
    %164 = arith.mulf %163, %161 : vector<16x32xf32>
    %cst_81 = arith.constant dense<0.000000e+00> : vector<16xf32>
    %165 = vector.multi_reduction <add>, %164, %cst_81 [1] : vector<16x32xf32> to vector<16xf32>
    %166 = vector.shape_cast %165 : vector<16xf32> to vector<16x1xf32>
    %c1_82 = arith.constant 1 : index
    %c0_83 = arith.constant 0 : index
    %c0_84 = arith.constant 0 : index
    %167 = vector.load %arg2[%c1_82, %c0_83, %c0_84] : memref<8x16x32xf32, #tpu.memory_space<vmem>>, vector<1x16x32xf32>
    %168 = vector.shape_cast %167 : vector<1x16x32xf32> to vector<16x32xf32>
    %169 = arith.mulf %168, %161 : vector<16x32xf32>
    %cst_85 = arith.constant dense<0.000000e+00> : vector<16xf32>
    %170 = vector.multi_reduction <add>, %169, %cst_85 [1] : vector<16x32xf32> to vector<16xf32>
    %171 = vector.shape_cast %170 : vector<16xf32> to vector<16x1xf32>
    %c2_86 = arith.constant 2 : index
    %c0_87 = arith.constant 0 : index
    %c0_88 = arith.constant 0 : index
    %172 = vector.load %arg2[%c2_86, %c0_87, %c0_88] : memref<8x16x32xf32, #tpu.memory_space<vmem>>, vector<1x16x32xf32>
    %173 = vector.shape_cast %172 : vector<1x16x32xf32> to vector<16x32xf32>
    %174 = arith.mulf %173, %161 : vector<16x32xf32>
    %cst_89 = arith.constant dense<0.000000e+00> : vector<16xf32>
    %175 = vector.multi_reduction <add>, %174, %cst_89 [1] : vector<16x32xf32> to vector<16xf32>
    %176 = vector.shape_cast %175 : vector<16xf32> to vector<16x1xf32>
    %c3_90 = arith.constant 3 : index
    %c0_91 = arith.constant 0 : index
    %c0_92 = arith.constant 0 : index
    %177 = vector.load %arg2[%c3_90, %c0_91, %c0_92] : memref<8x16x32xf32, #tpu.memory_space<vmem>>, vector<1x16x32xf32>
    %178 = vector.shape_cast %177 : vector<1x16x32xf32> to vector<16x32xf32>
    %179 = arith.mulf %178, %161 : vector<16x32xf32>
    %cst_93 = arith.constant dense<0.000000e+00> : vector<16xf32>
    %180 = vector.multi_reduction <add>, %179, %cst_93 [1] : vector<16x32xf32> to vector<16xf32>
    %181 = vector.shape_cast %180 : vector<16xf32> to vector<16x1xf32>
    %c4_94 = arith.constant 4 : index
    %c0_95 = arith.constant 0 : index
    %c0_96 = arith.constant 0 : index
    %182 = vector.load %arg2[%c4_94, %c0_95, %c0_96] : memref<8x16x32xf32, #tpu.memory_space<vmem>>, vector<1x16x32xf32>
    %183 = vector.shape_cast %182 : vector<1x16x32xf32> to vector<16x32xf32>
    %184 = arith.mulf %183, %161 : vector<16x32xf32>
    %cst_97 = arith.constant dense<0.000000e+00> : vector<16xf32>
    %185 = vector.multi_reduction <add>, %184, %cst_97 [1] : vector<16x32xf32> to vector<16xf32>
    %186 = vector.shape_cast %185 : vector<16xf32> to vector<16x1xf32>
    %c5_98 = arith.constant 5 : index
    %c0_99 = arith.constant 0 : index
    %c0_100 = arith.constant 0 : index
    %187 = vector.load %arg2[%c5_98, %c0_99, %c0_100] : memref<8x16x32xf32, #tpu.memory_space<vmem>>, vector<1x16x32xf32>
    %188 = vector.shape_cast %187 : vector<1x16x32xf32> to vector<16x32xf32>
    %189 = arith.mulf %188, %161 : vector<16x32xf32>
    %cst_101 = arith.constant dense<0.000000e+00> : vector<16xf32>
    %190 = vector.multi_reduction <add>, %189, %cst_101 [1] : vector<16x32xf32> to vector<16xf32>
    %191 = vector.shape_cast %190 : vector<16xf32> to vector<16x1xf32>
    %c6_102 = arith.constant 6 : index
    %c0_103 = arith.constant 0 : index
    %c0_104 = arith.constant 0 : index
    %192 = vector.load %arg2[%c6_102, %c0_103, %c0_104] : memref<8x16x32xf32, #tpu.memory_space<vmem>>, vector<1x16x32xf32>
    %193 = vector.shape_cast %192 : vector<1x16x32xf32> to vector<16x32xf32>
    %194 = arith.mulf %193, %161 : vector<16x32xf32>
    %cst_105 = arith.constant dense<0.000000e+00> : vector<16xf32>
    %195 = vector.multi_reduction <add>, %194, %cst_105 [1] : vector<16x32xf32> to vector<16xf32>
    %196 = vector.shape_cast %195 : vector<16xf32> to vector<16x1xf32>
    %c7_106 = arith.constant 7 : index
    %c0_107 = arith.constant 0 : index
    %c0_108 = arith.constant 0 : index
    %197 = vector.load %arg2[%c7_106, %c0_107, %c0_108] : memref<8x16x32xf32, #tpu.memory_space<vmem>>, vector<1x16x32xf32>
    %198 = vector.shape_cast %197 : vector<1x16x32xf32> to vector<16x32xf32>
    %199 = arith.mulf %198, %161 : vector<16x32xf32>
    %cst_109 = arith.constant dense<0.000000e+00> : vector<16xf32>
    %200 = vector.multi_reduction <add>, %199, %cst_109 [1] : vector<16x32xf32> to vector<16xf32>
    %201 = vector.shape_cast %200 : vector<16xf32> to vector<16x1xf32>
    %202 = arith.maximumf %166, %171 : vector<16x1xf32>
    %203 = arith.maximumf %202, %176 : vector<16x1xf32>
    %204 = arith.maximumf %203, %181 : vector<16x1xf32>
    %205 = arith.maximumf %204, %186 : vector<16x1xf32>
    %206 = arith.maximumf %205, %191 : vector<16x1xf32>
    %207 = arith.maximumf %206, %196 : vector<16x1xf32>
    %208 = arith.maximumf %207, %201 : vector<16x1xf32>
    %209 = arith.subf %166, %208 : vector<16x1xf32>
    %210 = math.exp %209 : vector<16x1xf32>
    %211 = arith.subf %171, %208 : vector<16x1xf32>
    %212 = math.exp %211 : vector<16x1xf32>
    %213 = arith.subf %176, %208 : vector<16x1xf32>
    %214 = math.exp %213 : vector<16x1xf32>
    %215 = arith.subf %181, %208 : vector<16x1xf32>
    %216 = math.exp %215 : vector<16x1xf32>
    %217 = arith.subf %186, %208 : vector<16x1xf32>
    %218 = math.exp %217 : vector<16x1xf32>
    %219 = arith.subf %191, %208 : vector<16x1xf32>
    %220 = math.exp %219 : vector<16x1xf32>
    %221 = arith.subf %196, %208 : vector<16x1xf32>
    %222 = math.exp %221 : vector<16x1xf32>
    %223 = arith.subf %201, %208 : vector<16x1xf32>
    %224 = math.exp %223 : vector<16x1xf32>
    %225 = arith.addf %210, %212 : vector<16x1xf32>
    %226 = arith.addf %225, %214 : vector<16x1xf32>
    %227 = arith.addf %226, %216 : vector<16x1xf32>
    %228 = arith.addf %227, %218 : vector<16x1xf32>
    %229 = arith.addf %228, %220 : vector<16x1xf32>
    %230 = arith.addf %229, %222 : vector<16x1xf32>
    %231 = arith.addf %230, %224 : vector<16x1xf32>
    %232 = tpu.reciprocal %231 {approx = true} : vector<16x1xf32> -> vector<16x1xf32>
    %233 = arith.mulf %210, %232 : vector<16x1xf32>
    %c0_110 = arith.constant 0 : index
    %c0_111 = arith.constant 0 : index
    %c0_112 = arith.constant 0 : index
    %234 = vector.load %arg2[%c0_110, %c0_111, %c0_112] : memref<8x16x32xf32, #tpu.memory_space<vmem>>, vector<1x16x32xf32>
    %235 = vector.shape_cast %234 : vector<1x16x32xf32> to vector<16x32xf32>
    %236 = vector.broadcast %233 : vector<16x1xf32> to vector<16x32xf32>
    %237 = arith.mulf %236, %235 : vector<16x32xf32>
    %238 = arith.addf %0, %237 : vector<16x32xf32>
    %239 = arith.mulf %212, %232 : vector<16x1xf32>
    %c1_113 = arith.constant 1 : index
    %c0_114 = arith.constant 0 : index
    %c0_115 = arith.constant 0 : index
    %240 = vector.load %arg2[%c1_113, %c0_114, %c0_115] : memref<8x16x32xf32, #tpu.memory_space<vmem>>, vector<1x16x32xf32>
    %241 = vector.shape_cast %240 : vector<1x16x32xf32> to vector<16x32xf32>
    %242 = vector.broadcast %239 : vector<16x1xf32> to vector<16x32xf32>
    %243 = arith.mulf %242, %241 : vector<16x32xf32>
    %244 = arith.addf %238, %243 : vector<16x32xf32>
    %245 = arith.mulf %214, %232 : vector<16x1xf32>
    %c2_116 = arith.constant 2 : index
    %c0_117 = arith.constant 0 : index
    %c0_118 = arith.constant 0 : index
    %246 = vector.load %arg2[%c2_116, %c0_117, %c0_118] : memref<8x16x32xf32, #tpu.memory_space<vmem>>, vector<1x16x32xf32>
    %247 = vector.shape_cast %246 : vector<1x16x32xf32> to vector<16x32xf32>
    %248 = vector.broadcast %245 : vector<16x1xf32> to vector<16x32xf32>
    %249 = arith.mulf %248, %247 : vector<16x32xf32>
    %250 = arith.addf %244, %249 : vector<16x32xf32>
    %251 = arith.mulf %216, %232 : vector<16x1xf32>
    %c3_119 = arith.constant 3 : index
    %c0_120 = arith.constant 0 : index
    %c0_121 = arith.constant 0 : index
    %252 = vector.load %arg2[%c3_119, %c0_120, %c0_121] : memref<8x16x32xf32, #tpu.memory_space<vmem>>, vector<1x16x32xf32>
    %253 = vector.shape_cast %252 : vector<1x16x32xf32> to vector<16x32xf32>
    %254 = vector.broadcast %251 : vector<16x1xf32> to vector<16x32xf32>
    %255 = arith.mulf %254, %253 : vector<16x32xf32>
    %256 = arith.addf %250, %255 : vector<16x32xf32>
    %257 = arith.mulf %218, %232 : vector<16x1xf32>
    %c4_122 = arith.constant 4 : index
    %c0_123 = arith.constant 0 : index
    %c0_124 = arith.constant 0 : index
    %258 = vector.load %arg2[%c4_122, %c0_123, %c0_124] : memref<8x16x32xf32, #tpu.memory_space<vmem>>, vector<1x16x32xf32>
    %259 = vector.shape_cast %258 : vector<1x16x32xf32> to vector<16x32xf32>
    %260 = vector.broadcast %257 : vector<16x1xf32> to vector<16x32xf32>
    %261 = arith.mulf %260, %259 : vector<16x32xf32>
    %262 = arith.addf %256, %261 : vector<16x32xf32>
    %263 = arith.mulf %220, %232 : vector<16x1xf32>
    %c5_125 = arith.constant 5 : index
    %c0_126 = arith.constant 0 : index
    %c0_127 = arith.constant 0 : index
    %264 = vector.load %arg2[%c5_125, %c0_126, %c0_127] : memref<8x16x32xf32, #tpu.memory_space<vmem>>, vector<1x16x32xf32>
    %265 = vector.shape_cast %264 : vector<1x16x32xf32> to vector<16x32xf32>
    %266 = vector.broadcast %263 : vector<16x1xf32> to vector<16x32xf32>
    %267 = arith.mulf %266, %265 : vector<16x32xf32>
    %268 = arith.addf %262, %267 : vector<16x32xf32>
    %269 = arith.mulf %222, %232 : vector<16x1xf32>
    %c6_128 = arith.constant 6 : index
    %c0_129 = arith.constant 0 : index
    %c0_130 = arith.constant 0 : index
    %270 = vector.load %arg2[%c6_128, %c0_129, %c0_130] : memref<8x16x32xf32, #tpu.memory_space<vmem>>, vector<1x16x32xf32>
    %271 = vector.shape_cast %270 : vector<1x16x32xf32> to vector<16x32xf32>
    %272 = vector.broadcast %269 : vector<16x1xf32> to vector<16x32xf32>
    %273 = arith.mulf %272, %271 : vector<16x32xf32>
    %274 = arith.addf %268, %273 : vector<16x32xf32>
    %275 = arith.mulf %224, %232 : vector<16x1xf32>
    %c7_131 = arith.constant 7 : index
    %c0_132 = arith.constant 0 : index
    %c0_133 = arith.constant 0 : index
    %276 = vector.load %arg2[%c7_131, %c0_132, %c0_133] : memref<8x16x32xf32, #tpu.memory_space<vmem>>, vector<1x16x32xf32>
    %277 = vector.shape_cast %276 : vector<1x16x32xf32> to vector<16x32xf32>
    %278 = vector.broadcast %275 : vector<16x1xf32> to vector<16x32xf32>
    %279 = arith.mulf %278, %277 : vector<16x32xf32>
    %280 = arith.addf %274, %279 : vector<16x32xf32>
    %c0_134 = arith.constant 0 : index
    %c0_135 = arith.constant 0 : index
    %281 = vector.load %arg3[%c0_134, %c0_135] : memref<16x32xf32, #tpu.memory_space<vmem>>, vector<16x32xf32>
    tpu.vector_store %arg3[%c0_134, %c0_135], %280 {strides = array<i32>} : memref<16x32xf32, #tpu.memory_space<vmem>>, vector<16x32xf32>,
    return
  }
  func.func @transform_0(%arg0: i32) -> (i32, i32) {
    %c0_i32 = arith.constant 0 : i32
    %c0_i32_0 = arith.constant 0 : i32
    return %arg0, %c0_i32 : i32, i32
  }
  func.func @transform_1(%arg0: i32) -> (i32, i32, i32) {
    %c0_i32 = arith.constant 0 : i32
    %c0_i32_0 = arith.constant 0 : i32
    %c0_i32_1 = arith.constant 0 : i32
    return %c0_i32, %arg0, %c0_i32_0 : i32, i32, i32
  }
  func.func @transform_2(%arg0: i32) -> (i32, i32) {
    %c0_i32 = arith.constant 0 : i32
    %c0_i32_0 = arith.constant 0 : i32
    return %arg0, %c0_i32 : i32, i32
  }
}

</mosaic_0001>

<bundles_post_ra>
// kernel: tpu_custom_call.1
= control target key start
LH: loop header
LB: loop body
LE: loop exit
PB: predicated region body
PF: predicated region fallthrough
CT: control target
= control target key end

     0   :  { %7 = vsyncpa [#allocation3], 0  ;;  %s931_s0 = inlined_call_operand.hbm [shape: f32[16,32], index: 0, kind: input, shape index: {}]   ;;  %s932_s1 = inlined_call_operand.hbm [shape: f32[8,16,32], index: 1, kind: input, shape index: {}]   ;;  %s933_s2 = inlined_call_operand.hbm [shape: f32[16,32], index: 2, kind: output, shape index: {}]  }
   0x1   :  { %8 = vsyncpa [#allocation6], 0 }
   0x2   :  { %9 = vsyncpa [#allocation4], 0  ;;  %s14_s11 = sshll.u32 %s931_s0, 4  ;;  %s717_s12 = smov [#allocation2]   ;;  %s15_s11 = int_to_ptr.hbm [resolvable:$true] %s14_s11 }
   0x3   :  { %s16_s13 = sshll.u32 %s717_s12, 4  ;;  %s27_s16 = sshll.u32 %s932_s1, 4  ;;  %s17_s13 = int_to_ptr.vmem [resolvable:$true] %s16_s13  ;;  %s28_s16 = int_to_ptr.hbm [resolvable:$true] %s27_s16 }
   0x4   :  { %s718_s17 = smov 128   ;;  %s719_s18 = smov 8  }
   0x5   :  { %22 = dma.hbm_to_vmem [thread:$0]  %s15_s11, 256, %s17_s13, [#allocation3], %s718_s17, %s718_s17, %s719_s18  }
   0x6   :  { %s720_s19 = smov [#allocation5]  }
   0x7   :  { %s29_s20 = sshll.u32 %s720_s19, 4  ;;  %s30_s20 = int_to_ptr.vmem [resolvable:$true] %s29_s20 }
   0x8   :  { %35 = dma.hbm_to_vmem [thread:$0]  %s28_s16, 2048, %s30_s20, [#allocation6], %s718_s17, %s718_s17, %s719_s18  }
   0x9   :  { %711 = dma.done.wait [#allocation3], 256  }
   0xa   :  { %712 = vsyncadd [#allocation3], 4294967040 }
   0xb   :  { %713 = dma.done.wait [#allocation6], 2048  }
   0xc   :  { %714 = vsyncadd [#allocation6], 4294965248  ;;  %v749_v0 = vld [vmem:[#allocation5] sm:$0xff]  ;;  %v751_v1 = vld [vmem:[#allocation5 + $0x10] sm:$0xff]  ;;  %vm89_vm0 = vcmask 261120   ;;  %s721_s0 = smov [#allocation7]  }
   0xd   :  { %v51_v2 = vadd.f32 %v751_v1, %v749_v0  ;;  %v755_v3 = vld [vmem:[#allocation5 + $0x20] sm:$0xff]  ;;  %v757_v4 = vld [vmem:[#allocation5 + $0x30] sm:$0xff]  ;;  %v760_v6 = vld [vmem:[#allocation5 + $0x8] sm:$0xff]  ;;  %s538_s1 = sshll.u32 %s721_s0, 4  ;;  %s540_s23 = sshll.u32 %s933_s2, 4  ;;  %s539_s1 = int_to_ptr.vmem [resolvable:$true] %s538_s1  ;;  %s541_s23 = int_to_ptr.hbm [resolvable:$true] %s540_s23 }
   0xe   :  { %v762_v7 = vld [vmem:[#allocation5 + $0x18] sm:$0xff]  ;;  %v764_v8 = vld [vmem:[#allocation5 + $0x40] sm:$0xff]  ;;  %v768_v10 = vld [vmem:[#allocation5 + $0x28] sm:$0xff] }
   0xf   :  { %v56_v5 = vadd.f32 %v755_v3, %v51_v2  ;;  %v52_v9 = vadd.f32 %v762_v7, %v760_v6  ;;  %v771_v12 = vld [vmem:[#allocation5 + $0x38] sm:$0xff]  ;;  %v773_v13 = vld [vmem:[#allocation5 + $0x50] sm:$0xff]  ;;  %v777_v16 = vld [vmem:[#allocation5 + $0x48] sm:$0xff] }
  0x10   :  { %v779_v17 = vld [vmem:[#allocation5 + $0x60] sm:$0xff]  ;;  %v783_v20 = vld [vmem:[#allocation5 + $0x58] sm:$0xff]  ;;  %v785_v21 = vld [vmem:[#allocation5 + $0x70] sm:$0xff] }
  0x11   :  { %v61_v11 = vadd.f32 %v757_v4, %v56_v5  ;;  %v57_v14 = vadd.f32 %v768_v10, %v52_v9  ;;  %v789_v24 = vld [vmem:[#allocation5 + $0x68] sm:$0xff]  ;;  %v793_v27 = vld [vmem:[#allocation5 + $0x78] sm:$0xff]  ;;  %v795_v28 = vld [vmem:[#allocation2] sm:$0xff] }
  0x12   :  { %v800_v33 = vld [vmem:[#allocation2 + $0x8] sm:$0xff] }
  0x13   :  { %v66_v15 = vadd.f32 %v764_v8, %v61_v11  ;;  %v62_v18 = vadd.f32 %v771_v12, %v57_v14 }
  0x15   :  { %v71_v19 = vadd.f32 %v773_v13, %v66_v15  ;;  %v67_v22 = vadd.f32 %v777_v16, %v62_v18 }
  0x17   :  { %v76_v23 = vadd.f32 %v779_v17, %v71_v19  ;;  %v72_v25 = vadd.f32 %v783_v20, %v67_v22 }
  0x19   :  { %v81_v26 = vadd.f32 %v785_v21, %v76_v23  ;;  %v77_v29 = vadd.f32 %v789_v24, %v72_v25 }
  0x1b   :  { %v83_v30 = vmul.f32 0.125, %v81_v26  ;;  %v82_v31 = vadd.f32 %v793_v27, %v77_v29 }
  0x1d   :  { %v85_v32 = vadd.f32 %v83_v30, %v795_v28  ;;  %v84_v34 = vmul.f32 0.125, %v82_v31 }
  0x1f   :  { %v87_v35 = vmul.f32 %v85_v32, %v85_v32  ;;  %v86_v36 = vadd.f32 %v84_v34, %v800_v33 }
  0x21   :  { %v90_v37 = vsel %vm89_vm0, %v87_v35, 0.0  ;;  %v88_v38 = vmul.f32 %v86_v36, %v86_v36 }
  0x22   :  { %91 = vadd.xlane.f32.xlu0 %v90_v37 }
  0x23   :  { %v93_v39 = vsel %vm89_vm0, %v88_v38, 0.0 }
  0x2a   :  { %94 = vadd.xlane.f32.xlu0 %v93_v39 }
  0x95   :  { %v92_v40 = vpop.xlane.xlu0 %91 }
  0x96   :  { %v96_v41 = vmax.f32 %v92_v40, 1e-24 }
  0x98   :  { %559 = vrsqrt.f32 %v96_v41  ;;  %vm104_vm2 = vweird.f32 %v96_v41 }
  0x9d   :  { %v95_v42 = vpop.xlane.xlu0 %94 }
  0x9e   :  { %v560_v43 = vpop.eup %559  ;;  %v97_v44 = vmax.f32 %v95_v42, 1e-24 }
  0x9f   :  { %v99_v45 = vmul.f32 %v560_v43, %v96_v41  ;;  %vm105_vm1 = vweird.f32 %v560_v43 }
  0xa0   :  { %561 = vrsqrt.f32 %v97_v44  ;;  %vm106_vm3 = vmor %vm104_vm2, %vm105_vm1  ;;  %vm114_vm5 = vweird.f32 %v97_v44 }
  0xa1   :  { %v100_v46 = vmul.f32 %v560_v43, %v99_v45 }
  0xa3   :  { %v101_v47 = vmul.f32 0.5, %v100_v46 }
  0xa5   :  { %v102_v48 = vsub.f32 1.5, %v101_v47 }
  0xa6   :  { %v562_v49 = vpop.eup %561 }
  0xa7   :  { %v103_v50 = vmul.f32 %v560_v43, %v102_v48  ;;  %v109_v51 = vmul.f32 %v562_v49, %v97_v44  ;;  %vm115_vm4 = vweird.f32 %v562_v49 }
  0xa8   :  { %vm116_vm6 = vmor %vm114_vm5, %vm115_vm4 }
  0xa9   :  { %v107_v52 = vsel %vm106_vm3, %v560_v43, %v103_v50  ;;  %v110_v53 = vmul.f32 %v562_v49, %v109_v51 }
  0xaa   :  { %v118_v54 = vmul.f32 %v107_v52, %v85_v32 }
  0xab   :  { %v111_v55 = vmul.f32 0.5, %v110_v53 }
  0xac   :  { %v136_v56 = vmul.f32 %v118_v54, %v755_v3  ;;  %v128_v57 = vmul.f32 %v118_v54, %v751_v1  ;;  %v120_v58 = vmul.f32 %v118_v54, %v749_v0  ;;  %v160_v22 = vmul.f32 %v118_v54, %v773_v13 }
  0xad   :  { %v112_v59 = vsub.f32 1.5, %v111_v55  ;;  %v144_v23 = vmul.f32 %v118_v54, %v757_v4  ;;  %v152_v34 = vmul.f32 %v118_v54, %v764_v8  ;;  %v168_v38 = vmul.f32 %v118_v54, %v779_v17 }
  0xae   :  { %v138_v60 = vsel %vm89_vm0, %v136_v56, 0.0  ;;  %v130_v61 = vsel %vm89_vm0, %v128_v57, 0.0  ;;  %v122_v62 = vsel %vm89_vm0, %v120_v58, 0.0  ;;  %v162_v26 = vsel %vm89_vm0, %v160_v22, 0.0 }
  0xaf   :  { %v113_v63 = vmul.f32 %v562_v49, %v112_v59  ;;  %139 = vadd.xlane.f32.xlu0 %v138_v60  ;;  %131 = vadd.xlane.f32.xlu2 %v130_v61  ;;  %v146_v29 = vsel %vm89_vm0, %v144_v23, 0.0  ;;  %v154_v37 = vsel %vm89_vm0, %v152_v34, 0.0  ;;  %v170_v40 = vsel %vm89_vm0, %v168_v38, 0.0 }
  0xb0   :  { %123 = vadd.xlane.f32.xlu1 %v122_v62  ;;  %v176_v43 = vmul.f32 %v118_v54, %v785_v21 }
  0xb1   :  { %v117_v2 = vsel %vm116_vm6, %v562_v49, %v113_v63 }
  0xb2   :  { %v119_v5 = vmul.f32 %v117_v2, %v86_v36  ;;  %v178_v45 = vsel %vm89_vm0, %v176_v43, 0.0 }
  0xb4   :  { %v145_v9 = vmul.f32 %v119_v5, %v771_v12  ;;  %v129_v11 = vmul.f32 %v119_v5, %v762_v7  ;;  %v121_v14 = vmul.f32 %v119_v5, %v760_v6  ;;  %v137_v25 = vmul.f32 %v119_v5, %v768_v10 }
  0xb5   :  { %v169_v31 = vmul.f32 %v119_v5, %v789_v24  ;;  %v153_v32 = vmul.f32 %v119_v5, %v777_v16  ;;  %v161_v39 = vmul.f32 %v119_v5, %v783_v20  ;;  %v177_v42 = vmul.f32 %v119_v5, %v793_v27 }
  0xb6   :  { %v149_v15 = vsel %vm89_vm0, %v145_v9, 0.0  ;;  %v133_v18 = vsel %vm89_vm0, %v129_v11, 0.0  ;;  %v125_v19 = vsel %vm89_vm0, %v121_v14, 0.0  ;;  %v141_v30 = vsel %vm89_vm0, %v137_v25, 0.0 }
  0xb7   :  { %150 = vadd.xlane.f32.xlu0 %v149_v15  ;;  %134 = vadd.xlane.f32.xlu2 %v133_v18  ;;  %v173_v35 = vsel %vm89_vm0, %v169_v31, 0.0  ;;  %v157_v36 = vsel %vm89_vm0, %v153_v32, 0.0  ;;  %v165_v41 = vsel %vm89_vm0, %v161_v39, 0.0  ;;  %v181_v44 = vsel %vm89_vm0, %v177_v42, 0.0 }
  0xb8   :  { %126 = vadd.xlane.f32.xlu1 %v125_v19 }
  0xbf   :  { %163 = vadd.xlane.f32.xlu0 %v162_v26  ;;  %147 = vadd.xlane.f32.xlu2 %v146_v29 }
  0xc0   :  { %142 = vadd.xlane.f32.xlu1 %v141_v30 }
  0xc7   :  { %174 = vadd.xlane.f32.xlu0 %v173_v35  ;;  %158 = vadd.xlane.f32.xlu2 %v157_v36 }
  0xc8   :  { %155 = vadd.xlane.f32.xlu1 %v154_v37 }
  0xcf   :  { %171 = vadd.xlane.f32.xlu2 %v170_v40 }
  0xd0   :  { %166 = vadd.xlane.f32.xlu1 %v165_v41 }
  0xd7   :  { %182 = vadd.xlane.f32.xlu2 %v181_v44 }
  0xd8   :  { %179 = vadd.xlane.f32.xlu1 %v178_v45 }
 0x122   :  { %v132_v46 = vpop.xlane.xlu2 %131  ;;  %v140_v48 = vpop.xlane.xlu0 %139 }
 0x123   :  { %v124_v47 = vpop.xlane.xlu1 %123 }
 0x124   :  { %v184_v58 = vmax.f32 %v124_v47, %v132_v46 }
 0x126   :  { %v186_v60 = vmax.f32 %v184_v58, %v140_v48 }
 0x12a   :  { %v135_v49 = vpop.xlane.xlu2 %134  ;;  %v151_v53 = vpop.xlane.xlu0 %150 }
 0x12b   :  { %v127_v50 = vpop.xlane.xlu1 %126 }
 0x12c   :  { %v185_v56 = vmax.f32 %v127_v50, %v135_v49 }
 0x132   :  { %v148_v51 = vpop.xlane.xlu2 %147  ;;  %v837_v54 = vpop.xlane.xlu0 %163 }
 0x133   :  { %v143_v52 = vpop.xlane.xlu1 %142  ;;  %v188_v63 = vmax.f32 %v186_v60, %v148_v51 }
 0x134   :  { %v187_v59 = vmax.f32 %v185_v56, %v143_v52 }
 0x136   :  { %v189_v61 = vmax.f32 %v187_v59, %v151_v53 }
 0x13a   :  { %v159_v55 = vpop.xlane.xlu2 %158  ;;  %v175_v14 = vpop.xlane.xlu0 %174 }
 0x13b   :  { %v156_v57 = vpop.xlane.xlu1 %155  ;;  %v191_v2 = vmax.f32 %v189_v61, %v159_v55 }
 0x13c   :  { %v190_v9 = vmax.f32 %v188_v63, %v156_v57 }
 0x13e   :  { %v192_v15 = vmax.f32 %v190_v9, %v837_v54 }
 0x142   :  { %v839_v62 = vpop.xlane.xlu2 %171 }
 0x143   :  { %v167_v5 = vpop.xlane.xlu1 %166  ;;  %v194_v22 = vmax.f32 %v192_v15, %v839_v62 }
 0x144   :  { %v193_v11 = vmax.f32 %v191_v2, %v167_v5 }
 0x146   :  { %v195_v18 = vmax.f32 %v193_v11, %v175_v14 }
 0x14a   :  { %v183_v19 = vpop.xlane.xlu2 %182 }
 0x14b   :  { %v197_v23 = vmax.f32 %v195_v18, %v183_v19  ;;  %v843_v25 = vpop.xlane.xlu1 %179 }
 0x14c   :  { %v196_v31 = vmax.f32 %v194_v22, %v843_v25 }
 0x14d   :  { %v199_v26 = vsub.f32 %v127_v50, %v197_v23  ;;  %v205_v29 = vsub.f32 %v135_v49, %v197_v23  ;;  %v211_v30 = vsub.f32 %v143_v52, %v197_v23  ;;  %v217_v32 = vsub.f32 %v151_v53, %v197_v23 }
 0x14e   :  { %v223_v36 = vsub.f32 %v159_v55, %v197_v23  ;;  %v229_v38 = vsub.f32 %v167_v5, %v197_v23  ;;  %v198_v39 = vsub.f32 %v124_v47, %v196_v31  ;;  %v204_v41 = vsub.f32 %v132_v46, %v196_v31 }
 0x14f   :  { %v202_v34 = vmul.f32 1.442695, %v199_v26  ;;  %v208_v35 = vmul.f32 1.442695, %v205_v29  ;;  %v214_v37 = vmul.f32 1.442695, %v211_v30  ;;  %v235_v43 = vsub.f32 %v175_v14, %v197_v23 }
 0x150   :  { %v220_v40 = vmul.f32 1.442695, %v217_v32  ;;  %v226_v42 = vmul.f32 1.442695, %v223_v36  ;;  %v232_v44 = vmul.f32 1.442695, %v229_v38  ;;  %v210_v45 = vsub.f32 %v140_v48, %v196_v31 }
 0x151   :  { %563 = vpow2.f32 %v202_v34  ;;  %v241_v49 = vsub.f32 %v183_v19, %v197_v23  ;;  %v200_v50 = vmul.f32 1.442695, %v198_v39  ;;  %v206_v52 = vmul.f32 1.442695, %v204_v41 }
 0x152   :  { %565 = vpow2.f32 %v208_v35  ;;  %v216_v53 = vsub.f32 %v148_v51, %v196_v31  ;;  %v238_v55 = vmul.f32 1.442695, %v235_v43  ;;  %v212_v59 = vmul.f32 1.442695, %v210_v45 }
 0x153   :  { %567 = vpow2.f32 %v214_v37  ;;  %v222_v47 = vsub.f32 %v156_v57, %v196_v31  ;;  %v244_v60 = vmul.f32 1.442695, %v241_v49  ;;  %v228_v48 = vsub.f32 %v837_v54, %v196_v31 }
 0x154   :  { %569 = vpow2.f32 %v220_v40  ;;  %v218_v63 = vmul.f32 1.442695, %v216_v53  ;;  %v234_v9 = vsub.f32 %v839_v62, %v196_v31  ;;  %v240_v18 = vsub.f32 %v843_v25, %v196_v31 }
 0x155   :  { %571 = vpow2.f32 %v226_v42  ;;  %v224_v51 = vmul.f32 1.442695, %v222_v47  ;;  %v230_v57 = vmul.f32 1.442695, %v228_v48 }
 0x156   :  { %573 = vpow2.f32 %v232_v44  ;;  %v236_v54 = vmul.f32 1.442695, %v234_v9  ;;  %v242_v34 = vmul.f32 1.442695, %v240_v18 }
 0x157   :  { %v564_v56 = vpop.eup %563  ;;  %575 = vpow2.f32 %v200_v50 }
 0x158   :  { %v566_v58 = vpop.eup %565  ;;  %577 = vpow2.f32 %v206_v52 }
 0x159   :  { %v247_v61 = vadd.f32 %v566_v58, %v564_v56  ;;  %v568_v46 = vpop.eup %567  ;;  %579 = vpow2.f32 %v238_v55 }
 0x15a   :  { %v570_v5 = vpop.eup %569  ;;  %581 = vpow2.f32 %v212_v59 }
 0x15b   :  { %v249_v2 = vadd.f32 %v568_v46, %v247_v61  ;;  %v572_v11 = vpop.eup %571  ;;  %583 = vpow2.f32 %v244_v60 }
 0x15c   :  { %v574_v15 = vpop.eup %573  ;;  %585 = vpow2.f32 %v218_v63 }
 0x15d   :  { %v251_v14 = vadd.f32 %v570_v5, %v249_v2  ;;  %v576_v19 = vpop.eup %575  ;;  %587 = vpow2.f32 %v224_v51 }
 0x15e   :  { %v578_v23 = vpop.eup %577  ;;  %589 = vpow2.f32 %v230_v57 }
 0x15f   :  { %v253_v22 = vadd.f32 %v572_v11, %v251_v14  ;;  %v580_v26 = vpop.eup %579  ;;  %v246_v30 = vadd.f32 %v578_v23, %v576_v19  ;;  %591 = vpow2.f32 %v236_v54 }
 0x160   :  { %v582_v32 = vpop.eup %581  ;;  %593 = vpow2.f32 %v242_v34 }
 0x161   :  { %v255_v29 = vadd.f32 %v574_v15, %v253_v22  ;;  %v584_v62 = vpop.eup %583  ;;  %v248_v36 = vadd.f32 %v582_v32, %v246_v30 }
 0x162   :  { %v586_v37 = vpop.eup %585 }
 0x163   :  { %v257_v35 = vadd.f32 %v580_v26, %v255_v29  ;;  %v250_v39 = vadd.f32 %v586_v37, %v248_v36  ;;  %v588_v40 = vpop.eup %587 }
 0x164   :  { %v590_v31 = vpop.eup %589 }
 0x165   :  { %v259_v38 = vadd.f32 %v584_v62, %v257_v35  ;;  %v252_v25 = vadd.f32 %v588_v40, %v250_v39  ;;  %v592_v42 = vpop.eup %591 }
 0x166   :  { %v594_v44 = vpop.eup %593 }
 0x167   :  { %595 = vrcp.f32 %v259_v38  ;;  %v254_v41 = vadd.f32 %v590_v31, %v252_v25 }
 0x169   :  { %v256_v43 = vadd.f32 %v592_v42, %v254_v41 }
 0x16b   :  { %v258_v49 = vadd.f32 %v594_v44, %v256_v43 }
 0x16d   :  { %v596_v45 = vpop.eup %595  ;;  %597 = vrcp.f32 %v258_v49 }
 0x16e   :  { %v263_v50 = vmul.f32 %v596_v45, %v564_v56  ;;  %v269_v53 = vmul.f32 %v596_v45, %v566_v58  ;;  %v275_v47 = vmul.f32 %v596_v45, %v568_v46  ;;  %v281_v61 = vmul.f32 %v596_v45, %v570_v5 }
 0x16f   :  { %v287_v51 = vmul.f32 %v596_v45, %v572_v11  ;;  %v293_v18 = vmul.f32 %v596_v45, %v574_v15  ;;  %v305_v34 = vmul.f32 %v596_v45, %v584_v62 }
 0x170   :  { %v265_v52 = vmul.f32 %v263_v50, %v760_v6  ;;  %v271_v59 = vmul.f32 %v269_v53, %v762_v7  ;;  %v277_v56 = vmul.f32 %v275_v47, %v768_v10  ;;  %v283_v57 = vmul.f32 %v281_v61, %v771_v12 }
 0x171   :  { %v289_v5 = vmul.f32 %v287_v51, %v777_v16  ;;  %v307_v43 = vmul.f32 %v305_v34, %v793_v27 }
 0x172   :  { %v267_v55 = vadd.f32 %v265_v52, %v800_v33 }
 0x173   :  { %v598_v60 = vpop.eup %597 }
 0x174   :  { %v262_v63 = vmul.f32 %v598_v60, %v576_v19  ;;  %v268_v48 = vmul.f32 %v598_v60, %v578_v23  ;;  %v273_v2 = vadd.f32 %v271_v59, %v267_v55  ;;  %v274_v14 = vmul.f32 %v598_v60, %v582_v32 }
 0x175   :  { %v280_v54 = vmul.f32 %v598_v60, %v586_v37  ;;  %v299_v19 = vmul.f32 %v596_v45, %v580_v26  ;;  %v286_v29 = vmul.f32 %v598_v60, %v588_v40  ;;  %v295_v32 = vmul.f32 %v293_v18, %v783_v20 }
 0x176   :  { %v264_v9 = vmul.f32 %v262_v63, %v749_v0  ;;  %v270_v22 = vmul.f32 %v268_v48, %v751_v1  ;;  %v279_v46 = vadd.f32 %v277_v56, %v273_v2  ;;  %v276_v11 = vmul.f32 %v274_v14, %v755_v3 }
 0x177   :  { %v282_v15 = vmul.f32 %v280_v54, %v757_v4  ;;  %v292_v36 = vmul.f32 %v598_v60, %v590_v31  ;;  %v301_v39 = vmul.f32 %v299_v19, %v789_v24  ;;  %v288_v25 = vmul.f32 %v286_v29, %v764_v8 }
 0x178   :  { %v266_v58 = vadd.f32 %v264_v9, %v795_v28  ;;  %v285_v30 = vadd.f32 %v283_v57, %v279_v46  ;;  %v298_v41 = vmul.f32 %v598_v60, %v592_v42  ;;  %v304_v50 = vmul.f32 %v598_v60, %v594_v44 }
 0x179   :  { %v294_v40 = vmul.f32 %v292_v36, %v773_v13 }
 0x17a   :  { %v272_v23 = vadd.f32 %v270_v22, %v266_v58  ;;  %v291_v38 = vadd.f32 %v289_v5, %v285_v30  ;;  %v300_v45 = vmul.f32 %v298_v41, %v779_v17  ;;  %v306_v55 = vmul.f32 %v304_v50, %v785_v21 }
 0x17c   :  { %v278_v35 = vadd.f32 %v276_v11, %v272_v23  ;;  %v297_v26 = vadd.f32 %v295_v32, %v291_v38 }
 0x17e   :  { %v284_v37 = vadd.f32 %v282_v15, %v278_v35  ;;  %v303_v52 = vadd.f32 %v301_v39, %v297_v26 }
 0x180   :  { %v290_v49 = vadd.f32 %v288_v25, %v284_v37  ;;  %v309_v53 = vadd.f32 %v307_v43, %v303_v52 }
 0x182   :  { %v296_v62 = vadd.f32 %v294_v40, %v290_v49  ;;  %v311_v59 = vmul.f32 %v309_v53, %v309_v53 }
 0x184   :  { %v302_v31 = vadd.f32 %v300_v45, %v296_v62  ;;  %v315_v61 = vsel %vm89_vm0, %v311_v59, 0.0 }
 0x185   :  { %316 = vadd.xlane.f32.xlu1 %v315_v61 }
 0x186   :  { %v308_v47 = vadd.f32 %v306_v55, %v302_v31 }
 0x188   :  { %v310_v42 = vmul.f32 %v308_v47, %v308_v47 }
 0x18a   :  { %v312_v63 = vsel %vm89_vm0, %v310_v42, 0.0 }
 0x18b   :  { %313 = vadd.xlane.f32.xlu0 %v312_v63 }
 0x1f8   :  { %v317_v48 = vpop.xlane.xlu1 %316 }
 0x1f9   :  { %v319_v2 = vmax.f32 %v317_v48, 1e-24 }
 0x1fb   :  { %599 = vrsqrt.f32 %v319_v2  ;;  %vm336_vm8 = vweird.f32 %v319_v2 }
 0x1fe   :  { %v314_v44 = vpop.xlane.xlu0 %313 }
 0x1ff   :  { %v318_v60 = vmax.f32 %v314_v44, 1e-24 }
 0x201   :  { %601 = vrsqrt.f32 %v318_v60  ;;  %v600_v51 = vpop.eup %599  ;;  %vm326_vm11 = vweird.f32 %v318_v60 }
 0x202   :  { %v331_v9 = vmul.f32 %v600_v51, %v319_v2  ;;  %vm337_vm7 = vweird.f32 %v600_v51 }
 0x203   :  { %vm338_vm9 = vmor %vm336_vm8, %vm337_vm7 }
 0x204   :  { %v332_v14 = vmul.f32 %v600_v51, %v331_v9 }
 0x206   :  { %v333_v57 = vmul.f32 0.5, %v332_v14 }
 0x207   :  { %v602_v56 = vpop.eup %601 }
 0x208   :  { %v321_v18 = vmul.f32 %v602_v56, %v318_v60  ;;  %v334_v58 = vsub.f32 1.5, %v333_v57  ;;  %vm327_vm10 = vweird.f32 %v602_v56 }
 0x209   :  { %vm328_vm12 = vmor %vm326_vm11, %vm327_vm10 }
 0x20a   :  { %v322_v22 = vmul.f32 %v602_v56, %v321_v18  ;;  %v335_v54 = vmul.f32 %v600_v51, %v334_v58 }
 0x20c   :  { %v323_v46 = vmul.f32 0.5, %v322_v22  ;;  %v339_v5 = vsel %vm338_vm9, %v600_v51, %v335_v54 }
 0x20d   :  { %v341_v23 = vmul.f32 %v339_v5, %v309_v53 }
 0x20e   :  { %v324_v19 = vsub.f32 1.5, %v323_v46 }
 0x20f   :  { %v343_v29 = vmul.f32 %v341_v23, %v760_v6  ;;  %v359_v25 = vmul.f32 %v341_v23, %v768_v10  ;;  %v351_v41 = vmul.f32 %v341_v23, %v762_v7  ;;  %v367_v49 = vmul.f32 %v341_v23, %v771_v12 }
 0x210   :  { %v325_v11 = vmul.f32 %v602_v56, %v324_v19  ;;  %v383_v55 = vmul.f32 %v341_v23, %v783_v20  ;;  %v375_v59 = vmul.f32 %v341_v23, %v777_v16  ;;  %v391_v42 = vmul.f32 %v341_v23, %v789_v24 }
 0x211   :  { %v347_v34 = vsel %vm89_vm0, %v343_v29, 0.0  ;;  %v363_v26 = vsel %vm89_vm0, %v359_v25, 0.0  ;;  %v355_v43 = vsel %vm89_vm0, %v351_v41, 0.0  ;;  %v371_v40 = vsel %vm89_vm0, %v367_v49, 0.0 }
 0x212   :  { %v329_v30 = vsel %vm328_vm12, %v602_v56, %v325_v11  ;;  %348 = vadd.xlane.f32.xlu0 %v347_v34  ;;  %v379_v61 = vsel %vm89_vm0, %v375_v59, 0.0  ;;  %v395_v63 = vsel %vm89_vm0, %v391_v42, 0.0  ;;  %v399_v51 = vmul.f32 %v341_v23, %v793_v27 }
 0x213   :  { %v340_v32 = vmul.f32 %v329_v30, %v308_v47  ;;  %v387_v47 = vsel %vm89_vm0, %v383_v55, 0.0 }
 0x214   :  { %v403_v9 = vsel %vm89_vm0, %v399_v51, 0.0 }
 0x215   :  { %v350_v35 = vmul.f32 %v340_v32, %v751_v1  ;;  %v342_v15 = vmul.f32 %v340_v32, %v749_v0  ;;  %v358_v39 = vmul.f32 %v340_v32, %v755_v3  ;;  %v374_v50 = vmul.f32 %v340_v32, %v764_v8 }
 0x216   :  { %v366_v52 = vmul.f32 %v340_v32, %v757_v4  ;;  %v382_v53 = vmul.f32 %v340_v32, %v773_v13  ;;  %v398_v48 = vmul.f32 %v340_v32, %v785_v21  ;;  %v390_v2 = vmul.f32 %v340_v32, %v779_v17 }
 0x217   :  { %v352_v36 = vsel %vm89_vm0, %v350_v35, 0.0  ;;  %v344_v38 = vsel %vm89_vm0, %v342_v15, 0.0  ;;  %v360_v37 = vsel %vm89_vm0, %v358_v39, 0.0  ;;  %v376_v62 = vsel %vm89_vm0, %v374_v50, 0.0 }
 0x218   :  { %353 = vadd.xlane.f32.xlu1 %v352_v36  ;;  %345 = vadd.xlane.f32.xlu2 %v344_v38  ;;  %v368_v45 = vsel %vm89_vm0, %v366_v52, 0.0  ;;  %v384_v31 = vsel %vm89_vm0, %v382_v53, 0.0  ;;  %v400_v44 = vsel %vm89_vm0, %v398_v48, 0.0  ;;  %v392_v60 = vsel %vm89_vm0, %v390_v2, 0.0 }
 0x21a   :  { %361 = vadd.xlane.f32.xlu0 %v360_v37 }
 0x220   :  { %364 = vadd.xlane.f32.xlu1 %v363_v26  ;;  %356 = vadd.xlane.f32.xlu2 %v355_v43 }
 0x222   :  { %372 = vadd.xlane.f32.xlu0 %v371_v40 }
 0x228   :  { %377 = vadd.xlane.f32.xlu1 %v376_v62  ;;  %369 = vadd.xlane.f32.xlu2 %v368_v45 }
 0x22a   :  { %385 = vadd.xlane.f32.xlu0 %v384_v31 }
 0x230   :  { %388 = vadd.xlane.f32.xlu1 %v387_v47  ;;  %380 = vadd.xlane.f32.xlu2 %v379_v61 }
 0x232   :  { %396 = vadd.xlane.f32.xlu0 %v395_v63 }
 0x238   :  { %401 = vadd.xlane.f32.xlu1 %v400_v44  ;;  %393 = vadd.xlane.f32.xlu2 %v392_v60 }
 0x240   :  { %404 = vadd.xlane.f32.xlu2 %v403_v9 }
 0x285   :  { %v349_v14 = vpop.xlane.xlu0 %348 }
 0x28b   :  { %v354_v56 = vpop.xlane.xlu1 %353  ;;  %v346_v57 = vpop.xlane.xlu2 %345 }
 0x28c   :  { %v406_v19 = vmax.f32 %v346_v57, %v354_v56 }
 0x28d   :  { %v362_v18 = vpop.xlane.xlu0 %361 }
 0x28e   :  { %v408_v11 = vmax.f32 %v406_v19, %v362_v18 }
 0x293   :  { %v365_v58 = vpop.xlane.xlu1 %364  ;;  %v357_v22 = vpop.xlane.xlu2 %356 }
 0x294   :  { %v407_v32 = vmax.f32 %v349_v14, %v357_v22 }
 0x295   :  { %v373_v54 = vpop.xlane.xlu0 %372 }
 0x296   :  { %v409_v35 = vmax.f32 %v407_v32, %v365_v58 }
 0x298   :  { %v411_v36 = vmax.f32 %v409_v35, %v373_v54 }
 0x29b   :  { %v378_v46 = vpop.xlane.xlu1 %377  ;;  %v370_v5 = vpop.xlane.xlu2 %369 }
 0x29c   :  { %v410_v34 = vmax.f32 %v408_v11, %v370_v5 }
 0x29d   :  { %v386_v23 = vpop.xlane.xlu0 %385 }
 0x29e   :  { %v412_v15 = vmax.f32 %v410_v34, %v378_v46 }
 0x2a0   :  { %v414_v38 = vmax.f32 %v412_v15, %v386_v23 }
 0x2a3   :  { %v901_v29 = vpop.xlane.xlu1 %388  ;;  %v381_v30 = vpop.xlane.xlu2 %380 }
 0x2a4   :  { %v413_v37 = vmax.f32 %v411_v36, %v381_v30 }
 0x2a5   :  { %v397_v43 = vpop.xlane.xlu0 %396 }
 0x2a6   :  { %v415_v52 = vmax.f32 %v413_v37, %v901_v29 }
 0x2a8   :  { %v417_v55 = vmax.f32 %v415_v52, %v397_v43 }
 0x2ab   :  { %v394_v39 = vpop.xlane.xlu2 %393  ;;  %v402_v41 = vpop.xlane.xlu1 %401 }
 0x2ac   :  { %v416_v25 = vmax.f32 %v414_v38, %v394_v39 }
 0x2ae   :  { %v418_v26 = vmax.f32 %v416_v25, %v402_v41 }
 0x2b0   :  { %v420_v49 = vsub.f32 %v346_v57, %v418_v26  ;;  %v426_v40 = vsub.f32 %v354_v56, %v418_v26  ;;  %v432_v50 = vsub.f32 %v362_v18, %v418_v26  ;;  %v438_v62 = vsub.f32 %v370_v5, %v418_v26 }
 0x2b1   :  { %v444_v31 = vsub.f32 %v378_v46, %v418_v26  ;;  %v450_v47 = vsub.f32 %v386_v23, %v418_v26  ;;  %v456_v2 = vsub.f32 %v394_v39, %v418_v26  ;;  %v462_v56 = vsub.f32 %v402_v41, %v418_v26 }
 0x2b2   :  { %v422_v45 = vmul.f32 1.442695, %v420_v49  ;;  %v428_v53 = vmul.f32 1.442695, %v426_v40  ;;  %v434_v59 = vmul.f32 1.442695, %v432_v50 }
 0x2b3   :  { %v405_v61 = vpop.xlane.xlu2 %404  ;;  %v440_v63 = vmul.f32 1.442695, %v438_v62  ;;  %v446_v48 = vmul.f32 1.442695, %v444_v31  ;;  %v452_v51 = vmul.f32 1.442695, %v450_v47 }
 0x2b4   :  { %603 = vpow2.f32 %v422_v45  ;;  %v419_v42 = vmax.f32 %v417_v55, %v405_v61  ;;  %v458_v19 = vmul.f32 1.442695, %v456_v2  ;;  %v464_v23 = vmul.f32 1.442695, %v462_v56 }
 0x2b5   :  { %605 = vpow2.f32 %v428_v53 }
 0x2b6   :  { %v421_v44 = vsub.f32 %v349_v14, %v419_v42  ;;  %v427_v60 = vsub.f32 %v357_v22, %v419_v42  ;;  %607 = vpow2.f32 %v434_v59  ;;  %v433_v9 = vsub.f32 %v365_v58, %v419_v42 }
 0x2b7   :  { %609 = vpow2.f32 %v440_v63  ;;  %v439_v46 = vsub.f32 %v373_v54, %v419_v42  ;;  %v445_v34 = vsub.f32 %v381_v30, %v419_v42  ;;  %v451_v58 = vsub.f32 %v901_v29, %v419_v42 }
 0x2b8   :  { %v424_v57 = vmul.f32 1.442695, %v421_v44  ;;  %v430_v18 = vmul.f32 1.442695, %v427_v60  ;;  %611 = vpow2.f32 %v446_v48  ;;  %v436_v32 = vmul.f32 1.442695, %v433_v9 }
 0x2b9   :  { %613 = vpow2.f32 %v452_v51  ;;  %v442_v22 = vmul.f32 1.442695, %v439_v46  ;;  %v448_v54 = vmul.f32 1.442695, %v445_v34  ;;  %v457_v38 = vsub.f32 %v397_v43, %v419_v42 }
 0x2ba   :  { %v604_v5 = vpop.eup %603  ;;  %615 = vpow2.f32 %v424_v57  ;;  %v454_v30 = vmul.f32 1.442695, %v451_v58  ;;  %v463_v41 = vsub.f32 %v405_v61, %v419_v42 }
 0x2bb   :  { %v606_v11 = vpop.eup %605  ;;  %617 = vpow2.f32 %v430_v18  ;;  %v460_v50 = vmul.f32 1.442695, %v457_v38 }
 0x2bc   :  { %v468_v35 = vadd.f32 %v606_v11, %v604_v5  ;;  %v608_v14 = vpop.eup %607  ;;  %619 = vpow2.f32 %v458_v19  ;;  %v466_v53 = vmul.f32 1.442695, %v463_v41 }
 0x2bd   :  { %v610_v36 = vpop.eup %609  ;;  %621 = vpow2.f32 %v436_v32 }
 0x2be   :  { %v470_v15 = vadd.f32 %v608_v14, %v468_v35  ;;  %v612_v39 = vpop.eup %611  ;;  %623 = vpow2.f32 %v464_v23 }
 0x2bf   :  { %v614_v25 = vpop.eup %613  ;;  %625 = vpow2.f32 %v442_v22 }
 0x2c0   :  { %v472_v37 = vadd.f32 %v610_v36, %v470_v15  ;;  %v616_v26 = vpop.eup %615  ;;  %627 = vpow2.f32 %v448_v54 }
 0x2c1   :  { %v618_v40 = vpop.eup %617  ;;  %629 = vpow2.f32 %v454_v30 }
 0x2c2   :  { %v474_v49 = vadd.f32 %v612_v39, %v472_v37  ;;  %v620_v52 = vpop.eup %619  ;;  %v469_v62 = vadd.f32 %v618_v40, %v616_v26  ;;  %631 = vpow2.f32 %v460_v50 }
 0x2c3   :  { %v622_v45 = vpop.eup %621  ;;  %633 = vpow2.f32 %v466_v53 }
 0x2c4   :  { %v476_v29 = vadd.f32 %v614_v25, %v474_v49  ;;  %v624_v31 = vpop.eup %623  ;;  %v471_v55 = vadd.f32 %v622_v45, %v469_v62 }
 0x2c5   :  { %v626_v59 = vpop.eup %625 }
 0x2c6   :  { %v478_v43 = vadd.f32 %v620_v52, %v476_v29  ;;  %v473_v63 = vadd.f32 %v626_v59, %v471_v55  ;;  %v628_v48 = vpop.eup %627 }
 0x2c7   :  { %v630_v42 = vpop.eup %629 }
 0x2c8   :  { %v480_v47 = vadd.f32 %v624_v31, %v478_v43  ;;  %v475_v61 = vadd.f32 %v628_v48, %v473_v63  ;;  %v632_v44 = vpop.eup %631 }
 0x2c9   :  { %v634_v51 = vpop.eup %633 }
 0x2ca   :  { %635 = vrcp.f32 %v480_v47  ;;  %v477_v2 = vadd.f32 %v630_v42, %v475_v61 }
 0x2cc   :  { %v479_v60 = vadd.f32 %v632_v44, %v477_v2 }
 0x2ce   :  { %v481_v56 = vadd.f32 %v634_v51, %v479_v60 }
 0x2d0   :  { %v636_v9 = vpop.eup %635  ;;  %637 = vrcp.f32 %v481_v56 }
 0x2d1   :  { %v484_v57 = vmul.f32 %v636_v9, %v604_v5  ;;  %v490_v18 = vmul.f32 %v636_v9, %v606_v11  ;;  %v496_v19 = vmul.f32 %v636_v9, %v608_v14  ;;  %v502_v23 = vmul.f32 %v636_v9, %v610_v36 }
 0x2d2   :  { %v508_v15 = vmul.f32 %v636_v9, %v612_v39  ;;  %v514_v11 = vmul.f32 %v636_v9, %v614_v25  ;;  %v520_v14 = vmul.f32 %v636_v9, %v620_v52 }
 0x2d3   :  { %v486_v46 = vmul.f32 %v484_v57, %v749_v0  ;;  %v492_v34 = vmul.f32 %v490_v18, %v751_v1  ;;  %v498_v58 = vmul.f32 %v496_v19, %v755_v3  ;;  %v504_v5 = vmul.f32 %v502_v23, %v757_v4 }
 0x2d4   :  { %v516_v39 = vmul.f32 %v514_v11, %v773_v13 }
 0x2d5   :  { %v488_v32 = vadd.f32 %v486_v46, %v795_v28  ;;  %v510_v28 = vmul.f32 %v508_v15, %v764_v8 }
 0x2d6   :  { %v638_v22 = vpop.eup %637 }
 0x2d7   :  { %v494_v35 = vadd.f32 %v492_v34, %v488_v32  ;;  %v485_v54 = vmul.f32 %v638_v22, %v616_v26  ;;  %v491_v38 = vmul.f32 %v638_v22, %v618_v40  ;;  %v497_v0 = vmul.f32 %v638_v22, %v622_v45 }
 0x2d8   :  { %v503_v49 = vmul.f32 %v638_v22, %v626_v59  ;;  %v526_v26 = vmul.f32 %v636_v9, %v624_v31  ;;  %v509_v25 = vmul.f32 %v638_v22, %v628_v48  ;;  %v515_v8 = vmul.f32 %v638_v22, %v630_v42 }
 0x2d9   :  { %v500_v37 = vadd.f32 %v498_v58, %v494_v35  ;;  %v487_v30 = vmul.f32 %v485_v54, %v760_v6  ;;  %v493_v36 = vmul.f32 %v491_v38, %v762_v7  ;;  %v499_v4 = vmul.f32 %v497_v0, %v768_v10 }
 0x2da   :  { %v522_v6 = vmul.f32 %v520_v14, %v779_v17  ;;  %v505_v29 = vmul.f32 %v503_v49, %v771_v12  ;;  %v511_v45 = vmul.f32 %v509_v25, %v777_v16  ;;  %v521_v53 = vmul.f32 %v638_v22, %v632_v44 }
 0x2db   :  { %v506_v41 = vadd.f32 %v504_v5, %v500_v37  ;;  %v489_v1 = vadd.f32 %v487_v30, %v800_v33  ;;  %v528_v33 = vmul.f32 %v526_v26, %v785_v21  ;;  %v527_v31 = vmul.f32 %v638_v22, %v634_v51 }
 0x2dc   :  { %v517_v10 = vmul.f32 %v515_v8, %v783_v20  ;;  %v523_v55 = vmul.f32 %v521_v53, %v789_v24 }
 0x2dd   :  { %v512_v3 = vadd.f32 %v510_v28, %v506_v41  ;;  %v495_v40 = vadd.f32 %v493_v36, %v489_v1  ;;  %v529_v12 = vmul.f32 %v527_v31, %v793_v27 }
 0x2df   :  { %v518_v50 = vadd.f32 %v516_v39, %v512_v3  ;;  %v501_v52 = vadd.f32 %v499_v4, %v495_v40 }
 0x2e1   :  { %v524_v62 = vadd.f32 %v522_v6, %v518_v50  ;;  %v507_v7 = vadd.f32 %v505_v29, %v501_v52 }
 0x2e3   :  { %v530_v13 = vadd.f32 %v528_v33, %v524_v62  ;;  %v513_v43 = vadd.f32 %v511_v45, %v507_v7 }
 0x2e5   :  { %532 = vst.msk [vmem:[#allocation7] sm:$0xff] %vm89_vm0, %v530_v13  ;;  %v519_v17 = vadd.f32 %v517_v10, %v513_v43 }
 0x2e7   :  { %v525_v16 = vadd.f32 %v523_v55, %v519_v17 }
 0x2e9   :  { %v531_v21 = vadd.f32 %v529_v12, %v525_v16 }
 0x2eb   :  { %533 = vst.msk [vmem:[#allocation7 + $0x8] sm:$0xff] %vm89_vm0, %v531_v21 }
 0x2ec   :  { %546 = dma.vmem_to_hbm [thread:$0]  %s539_s1, 256, %s541_s23, [#allocation4], %s718_s17, %s718_s17, %s719_s18  }
 0x2ed   :  { %715 = dma.done.wait [#allocation4], 256  }
 0x2ee   :  { %716 = vsyncadd [#allocation4], 4294967040 }
 0x2ef   :  { %551 = vsyncpa [#allocation3], 1 }
 0x2f0   :  { %552 = vsyncpa [#allocation6], 1 }
 0x2f1   :  { %553 = vsyncpa [#allocation4], 1 }

</bundles_post_ra>
